<compile_context>
chip_gen: v7x
topology: tpu7x:2x2x1
jax: 0.10.0
libtpu: 0.0.40
codegen_flags: <defaults>
</compile_context>

<pallas_src>
import math

import jax
import jax.numpy as jnp
from jax import lax
from jax.experimental import pallas as pl
from jax.experimental.pallas import tpu as pltpu

PACK_W = 128  # lane-dense packed output width


def _round_up(x, m):
    return ((x + m - 1) // m) * m


def actor_critic_kernel(
    state_ref, action_ref,
    w1_ref, b1_ref, w2_ref, b2_ref, w3_ref, b3_ref,
    inv_var_ref, logp_const_ref,
    out_ref,
):
    x = state_ref[...]                                             # [TB, S]
    a_dim = action_ref.shape[-1]

    # Fused actor|critic MLP: layer1 [S,2H], layer2 block-diag [2H,2H],
    # layer3 packed [2H, 128] (actor cols 0..A-1, critic value col A).
    h = jnp.tanh(jnp.dot(x, w1_ref[...],
                         preferred_element_type=jnp.float32) + b1_ref[...])
    h = jnp.tanh(jnp.dot(h, w2_ref[...],
                         preferred_element_type=jnp.float32) + b2_ref[...])
    y = jnp.dot(h, w3_ref[...],
                preferred_element_type=jnp.float32) + b3_ref[...]  # [TB, 128]

    # tanh over the full lane width is cheap (EUP); select actor columns only.
    y_tanh = jnp.tanh(y)
    col = lax.broadcasted_iota(jnp.int32, y.shape, 1)
    packed = jnp.where(col < a_dim, y_tanh, y)   # mean in 0..A-1, value at A

    # MVN(mean, diag(var)).log_prob(action); constants precomputed in wrapper.
    mean = y_tanh[:, :a_dim]                                       # [TB, A]
    diff = action_ref[...] - mean                                  # [TB, A]
    quad = jnp.sum(diff * diff * inv_var_ref[...], axis=-1,
                   keepdims=True)                                  # [TB, 1]
    logp = -0.5 * quad + logp_const_ref[0, 0]                      # [TB, 1]

    packed = jnp.where(col == a_dim + 1, logp, packed)
    out_ref[...] = packed                                          # [TB, 128]


def pack_params(params, action_dim, out_width=PACK_W):
    """Fuse actor+critic weights: concat L1, block-diag L2, lane-packed L3."""
    S, H = params["w1a"].shape
    A = action_dim

    w1 = jnp.concatenate([params["w1a"], params["w1c"]], axis=1)   # [S, 2H]
    b1 = jnp.concatenate([params["b1a"], params["b1c"]], axis=1)   # [1, 2H]

    z = jnp.zeros((H, H), jnp.float32)
    w2 = jnp.block([[params["w2a"], z], [z, params["w2c"]]])       # [2H, 2H]
    b2 = jnp.concatenate([params["b2a"], params["b2c"]], axis=1)   # [1, 2H]

    w3 = jnp.zeros((2 * H, out_width), jnp.float32)
    w3 = w3.at[:H, :A].set(params["w3a"])
    w3 = w3.at[H:, A:A + 1].set(params["w3c"])
    b3 = jnp.zeros((1, out_width), jnp.float32)
    b3 = b3.at[0, :A].set(params["b3a"][0])
    b3 = b3.at[0, A:A + 1].set(params["b3c"][0])
    return dict(w1=w1, b1=b1, w2=w2, b2=b2, w3=w3, b3=b3, S=S, H2=2 * H)


def actor_critic_evaluate(state, action, params, action_var, block_b=256):
    """state [B,S] f32, action [B,A] f32 -> (logprob[B], value[B], entropy[B], mean[B,A])."""
    B, S = state.shape
    A = action.shape[1]
    assert A + 2 <= PACK_W, "action_dim too large for packed output width"

    packed = pack_params(params, A, PACK_W)
    H2 = packed["H2"]

    # Batch tiling: tile rows in multiples of 8 (sublane); pad the batch so it
    # divides evenly, slice padded rows off afterwards.
    tb = min(block_b, _round_up(B, 8))
    B_pad = _round_up(B, tb)
    if B_pad != B:
        pad = B_pad - B
        state = jnp.pad(state, ((0, pad), (0, 0)))
        action = jnp.pad(action, ((0, pad), (0, 0)))

    # Batch-invariant distribution constants, computed once in the wrapper.
    log2pi = math.log(2.0 * math.pi)
    inv_var = (1.0 / action_var).reshape(1, A).astype(jnp.float32)
    log_det = jnp.sum(jnp.log(action_var))
    logp_const = (-0.5 * (log_det + A * log2pi)).reshape(1, 1).astype(jnp.float32)

    grid = (B_pad // tb,)

    def resident(shape):  # weight/bias/const: VMEM-resident across grid steps
        return pl.BlockSpec(shape, lambda i: (0, 0))

    out = pl.pallas_call(
        actor_critic_kernel,
        out_shape=jax.ShapeDtypeStruct((B_pad, PACK_W), jnp.float32),
        grid=grid,
        in_specs=[
            pl.BlockSpec((tb, S), lambda i: (i, 0)),     # state (streamed)
            pl.BlockSpec((tb, A), lambda i: (i, 0)),     # action (streamed)
            resident((S, H2)), resident((1, H2)),        # fused layer 1
            resident((H2, H2)), resident((1, H2)),       # fused layer 2
            resident((H2, PACK_W)), resident((1, PACK_W)),  # fused layer 3
            resident((1, A)),                            # inv_var
            resident((1, 1)),                            # logp const
        ],
        out_specs=pl.BlockSpec((tb, PACK_W), lambda i: (i, 0)),
        compiler_params=pltpu.CompilerParams(
            dimension_semantics=("parallel",),
            vmem_limit_bytes=32 * 1024 * 1024,
        ),
    )(state, action,
      packed["w1"], packed["b1"], packed["w2"], packed["b2"],
      packed["w3"], packed["b3"], inv_var, logp_const)

    mean = out[:B, :A]
    value = out[:B, A]
    logp = out[:B, A + 1]
    ent_scalar = 0.5 * A * (1.0 + log2pi) + 0.5 * log_det  # batch-invariant
    ent = jnp.full((B,), ent_scalar, jnp.float32)
    # PyTorch evaluate returns (action_logprobs, squeeze(state_value), dist_entropy)
    return logp, value, ent, mean


def init_params(key, state_dim, n_var, action_dim):
    """Deterministic init mimicking torch.nn.Linear default (uniform +-1/sqrt(fan_in))."""
    def linear(k, fan_in, fan_out):
        kw, kb = jax.random.split(k)
        bound = 1.0 / math.sqrt(fan_in)
        w = jax.random.uniform(kw, (fan_in, fan_out), jnp.float32, -bound, bound)
        b = jax.random.uniform(kb, (1, fan_out), jnp.float32, -bound, bound)
        return w, b

    keys = jax.random.split(key, 6)
    w1a, b1a = linear(keys[0], state_dim, n_var)
    w2a, b2a = linear(keys[1], n_var, n_var)
    w3a, b3a = linear(keys[2], n_var, action_dim)
    w1c, b1c = linear(keys[3], state_dim, n_var)
    w2c, b2c = linear(keys[4], n_var, n_var)
    w3c, b3c = linear(keys[5], n_var, 1)
    return dict(w1a=w1a, b1a=b1a, w2a=w2a, b2a=b2a, w3a=w3a, b3a=b3a,
                w1c=w1c, b1c=b1c, w2c=w2c, b2c=b2c, w3c=w3c, b3c=b3c)


def reference_evaluate(state, action, params, action_var):
    """Pure-JAX reference matching the PyTorch semantics."""
    h = jnp.tanh(state @ params["w1a"] + params["b1a"])
    h = jnp.tanh(h @ params["w2a"] + params["b2a"])
    mean = jnp.tanh(h @ params["w3a"] + params["b3a"])

    c = jnp.tanh(state @ params["w1c"] + params["b1c"])
    c = jnp.tanh(c @ params["w2c"] + params["b2c"])
    value = (c @ params["w3c"] + params["b3c"])[:, 0]

    A = mean.shape[-1]
    log2pi = math.log(2.0 * math.pi)
    log_det = jnp.sum(jnp.log(action_var))
    quad = jnp.sum((action - mean) ** 2 / action_var, axis=-1)
    logp = -0.5 * (quad + log_det + A * log2pi)
    ent = jnp.full((mean.shape[0],), 0.5 * A * (1.0 + log2pi) + 0.5 * log_det)
    return logp, value, ent, mean


def _check(state, action, params, action_var, block_b):
    logp, value, ent, mean = actor_critic_evaluate(
        state, action, params, action_var, block_b=block_b)
    jax.block_until_ready((logp, value, ent, mean))
    logp_r, value_r, ent_r, mean_r = reference_evaluate(state, action, params, action_var)
    assert jnp.allclose(mean, mean_r, atol=1e-5), "action_mean mismatch"
    assert jnp.allclose(logp, logp_r, atol=1e-4), "log_prob mismatch"
    assert jnp.allclose(value, value_r, atol=1e-5), "state_value mismatch"
    assert jnp.allclose(ent, ent_r, atol=1e-5), "entropy mismatch"


if __name__ == "__main__":
    # Small, module-consistent shapes: batch of flat states -> actions.
    state_dim = 16
    action_dim = 4
    n_var = 32
    action_std = 0.5

    key = jax.random.PRNGKey(0)
    k_params, k_state, k_action = jax.random.split(key, 3)

    params = init_params(k_params, state_dim, n_var, action_dim)
    action_var = jnp.full((action_dim,), action_std * action_std, jnp.float32)

    # Case 1: small batch (single grid step).
    state = jax.random.normal(k_state, (8, state_dim), jnp.float32)
    action = jax.random.normal(k_action, (8, action_dim), jnp.float32)
    _check(state, action, params, action_var, block_b=256)

    # Case 2: batch not a multiple of the tile (exercises grid + padding path).
    state2 = jax.random.normal(jax.random.fold_in(k_state, 1), (50, state_dim), jnp.float32)
    action2 = jax.random.normal(jax.random.fold_in(k_action, 1), (50, action_dim), jnp.float32)
    _check(state2, action2, params, action_var, block_b=16)

    print("KERNEL_OK")
</pallas_src>

<mosaic_0001>
module attributes {stable_mosaic.version = 11 : i64} {
  func.func @actor_critic_kernel(%arg0: i32, %arg1: memref<8x16xf32, #tpu.memory_space<vmem>>, %arg2: memref<8x4xf32, #tpu.memory_space<vmem>>, %arg3: memref<16x64xf32, #tpu.memory_space<vmem>>, %arg4: memref<1x64xf32, #tpu.memory_space<vmem>>, %arg5: memref<64x64xf32, #tpu.memory_space<vmem>>, %arg6: memref<1x64xf32, #tpu.memory_space<vmem>>, %arg7: memref<64x128xf32, #tpu.memory_space<vmem>>, %arg8: memref<1x128xf32, #tpu.memory_space<vmem>>, %arg9: memref<1x4xf32, #tpu.memory_space<vmem>>, %arg10: memref<1x1xf32, #tpu.memory_space<vmem>>, %arg11: memref<8x128xf32, #tpu.memory_space<vmem>>) attributes {dimension_semantics = [#tpu.dimension_semantics<parallel>], iteration_bounds = array<i64: 1>, scalar_prefetch = 0 : i64, scratch_operands = 0 : i64, tpu.core_type = #tpu.core_type<tc>, window_params = [{transform_indices = @transform_0, window_bounds = array<i64: 8, 16>}, {transform_indices = @transform_1, window_bounds = array<i64: 8, 4>}, {pipeline_mode = #tpu.pipeline_mode<synchronous>, transform_indices = @transform_2, window_bounds = array<i64: 16, 64>}, {pipeline_mode = #tpu.pipeline_mode<synchronous>, transform_indices = @transform_3, window_bounds = array<i64: 1, 64>}, {pipeline_mode = #tpu.pipeline_mode<synchronous>, transform_indices = @transform_4, window_bounds = array<i64: 64, 64>}, {pipeline_mode = #tpu.pipeline_mode<synchronous>, transform_indices = @transform_5, window_bounds = array<i64: 1, 64>}, {pipeline_mode = #tpu.pipeline_mode<synchronous>, transform_indices = @transform_6, window_bounds = array<i64: 64, 128>}, {pipeline_mode = #tpu.pipeline_mode<synchronous>, transform_indices = @transform_7, window_bounds = array<i64: 1, 128>}, {pipeline_mode = #tpu.pipeline_mode<synchronous>, transform_indices = @transform_8, window_bounds = array<i64: 1, 4>}, {pipeline_mode = #tpu.pipeline_mode<synchronous>, transform_indices = @transform_9, window_bounds = array<i64: 1, 1>}, {transform_indices = @transform_10, window_bounds = array<i64: 8, 128>}]} {
    %c0 = arith.constant 0 : index
    %c0_0 = arith.constant 0 : index
    %0 = vector.load %arg1[%c0, %c0_0] : memref<8x16xf32, #tpu.memory_space<vmem>>, vector<8x16xf32>
    %c0_1 = arith.constant 0 : index
    %c0_2 = arith.constant 0 : index
    %1 = vector.load %arg3[%c0_1, %c0_2] : memref<16x64xf32, #tpu.memory_space<vmem>>, vector<16x64xf32>
    %cst = arith.constant dense<0.000000e+00> : vector<8x64xf32>
    %2 = tpu.matmul %0, %1, %cst {dimension_numbers = #tpu.dot_dimension_numbers<[1], [0], [0], [1], [0, 0, 1, 1], [], []>} : vector<8x16xf32>, vector<16x64xf32>, vector<8x64xf32> -> vector<8x64xf32>
    %c0_3 = arith.constant 0 : index
    %c0_4 = arith.constant 0 : index
    %3 = vector.load %arg4[%c0_3, %c0_4] : memref<1x64xf32, #tpu.memory_space<vmem>>, vector<1x64xf32>
    %4 = vector.broadcast %3 : vector<1x64xf32> to vector<8x64xf32>
    %5 = arith.addf %2, %4 : vector<8x64xf32>
    %6 = math.tanh %5 : vector<8x64xf32>
    %c0_5 = arith.constant 0 : index
    %c0_6 = arith.constant 0 : index
    %7 = vector.load %arg5[%c0_5, %c0_6] : memref<64x64xf32, #tpu.memory_space<vmem>>, vector<64x64xf32>
    %cst_7 = arith.constant dense<0.000000e+00> : vector<8x64xf32>
    %8 = tpu.matmul %6, %7, %cst_7 {dimension_numbers = #tpu.dot_dimension_numbers<[1], [0], [0], [1], [0, 0, 1, 1], [], []>} : vector<8x64xf32>, vector<64x64xf32>, vector<8x64xf32> -> vector<8x64xf32>
    %c0_8 = arith.constant 0 : index
    %c0_9 = arith.constant 0 : index
    %9 = vector.load %arg6[%c0_8, %c0_9] : memref<1x64xf32, #tpu.memory_space<vmem>>, vector<1x64xf32>
    %10 = vector.broadcast %9 : vector<1x64xf32> to vector<8x64xf32>
    %11 = arith.addf %8, %10 : vector<8x64xf32>
    %12 = math.tanh %11 : vector<8x64xf32>
    %c0_10 = arith.constant 0 : index
    %c0_11 = arith.constant 0 : index
    %13 = vector.load %arg7[%c0_10, %c0_11] : memref<64x128xf32, #tpu.memory_space<vmem>>, vector<64x128xf32>
    %cst_12 = arith.constant dense<0.000000e+00> : vector<8x128xf32>
    %14 = tpu.matmul %12, %13, %cst_12 {dimension_numbers = #tpu.dot_dimension_numbers<[1], [0], [0], [1], [0, 0, 1, 1], [], []>} : vector<8x64xf32>, vector<64x128xf32>, vector<8x128xf32> -> vector<8x128xf32>
    %c0_13 = arith.constant 0 : index
    %c0_14 = arith.constant 0 : index
    %15 = vector.load %arg8[%c0_13, %c0_14] : memref<1x128xf32, #tpu.memory_space<vmem>>, vector<1x128xf32>
    %16 = vector.broadcast %15 : vector<1x128xf32> to vector<8x128xf32>
    %17 = arith.addf %14, %16 : vector<8x128xf32>
    %18 = math.tanh %17 : vector<8x128xf32>
    %19 = tpu.iota {dimensions = array<i32: 1>} : vector<8x128xi32>
    %c4_i32 = arith.constant 4 : i32
    %20 = vector.broadcast %c4_i32 : i32 to vector<8x128xi32>
    %21 = arith.cmpi slt, %19, %20 : vector<8x128xi32>
    %22 = arith.select %21, %18, %17 : vector<8x128xi1>, vector<8x128xf32>
    %23 = vector.extract_strided_slice %18 {offsets = [0, 0], sizes = [8, 4], strides = [1, 1]} : vector<8x128xf32> to vector<8x4xf32>
    %c0_15 = arith.constant 0 : index
    %c0_16 = arith.constant 0 : index
    %24 = vector.load %arg2[%c0_15, %c0_16] : memref<8x4xf32, #tpu.memory_space<vmem>>, vector<8x4xf32>
    %25 = arith.subf %24, %23 : vector<8x4xf32>
    %26 = arith.mulf %25, %25 : vector<8x4xf32>
    %c0_17 = arith.constant 0 : index
    %c0_18 = arith.constant 0 : index
    %27 = vector.load %arg9[%c0_17, %c0_18] : memref<1x4xf32, #tpu.memory_space<vmem>>, vector<1x4xf32>
    %28 = vector.broadcast %27 : vector<1x4xf32> to vector<8x4xf32>
    %29 = arith.mulf %26, %28 : vector<8x4xf32>
    %cst_19 = arith.constant dense<0.000000e+00> : vector<8xf32>
    %30 = vector.multi_reduction <add>, %29, %cst_19 [1] : vector<8x4xf32> to vector<8xf32>
    %31 = vector.shape_cast %30 : vector<8xf32> to vector<8x1xf32>
    %cst_20 = arith.constant -5.000000e-01 : f32
    %32 = vector.broadcast %cst_20 : f32 to vector<8x1xf32>
    %33 = arith.mulf %32, %31 : vector<8x1xf32>
    %c0_21 = arith.constant 0 : index
    %c0_22 = arith.constant 0 : index
    %34 = vector.load %arg10[%c0_21, %c0_22] : memref<1x1xf32, #tpu.memory_space<vmem>>, vector<1x1xf32>
    %35 = vector.extract %34[0, 0] : f32 from vector<1x1xf32>
    %36 = vector.broadcast %35 : f32 to vector<8x1xf32>
    %37 = arith.addf %33, %36 : vector<8x1xf32>
    %c5_i32 = arith.constant 5 : i32
    %38 = vector.broadcast %c5_i32 : i32 to vector<8x128xi32>
    %39 = arith.cmpi eq, %19, %38 : vector<8x128xi32>
    %40 = vector.shape_cast %37 : vector<8x1xf32> to vector<8x1xf32>
    %41 = vector.broadcast %40 : vector<8x1xf32> to vector<8x128xf32>
    %42 = arith.select %39, %41, %22 : vector<8x128xi1>, vector<8x128xf32>
    %c0_23 = arith.constant 0 : index
    %c0_24 = arith.constant 0 : index
    %43 = vector.load %arg11[%c0_23, %c0_24] : memref<8x128xf32, #tpu.memory_space<vmem>>, vector<8x128xf32>
    tpu.vector_store %arg11[%c0_23, %c0_24], %42 {strides = array<i32>} : memref<8x128xf32, #tpu.memory_space<vmem>>, vector<8x128xf32>,
    return
  }
  func.func @transform_0(%arg0: i32) -> (i32, i32) {
    %c0_i32 = arith.constant 0 : i32
    %c0_i32_0 = arith.constant 0 : i32
    return %arg0, %c0_i32 : i32, i32
  }
  func.func @transform_1(%arg0: i32) -> (i32, i32) {
    %c0_i32 = arith.constant 0 : i32
    %c0_i32_0 = arith.constant 0 : i32
    return %arg0, %c0_i32 : i32, i32
  }
  func.func @transform_2(%arg0: i32) -> (i32, i32) {
    %c0_i32 = arith.constant 0 : i32
    %c0_i32_0 = arith.constant 0 : i32
    %c0_i32_1 = arith.constant 0 : i32
    return %c0_i32, %c0_i32_0 : i32, i32
  }
  func.func @transform_3(%arg0: i32) -> (i32, i32) {
    %c0_i32 = arith.constant 0 : i32
    %c0_i32_0 = arith.constant 0 : i32
    %c0_i32_1 = arith.constant 0 : i32
    return %c0_i32, %c0_i32_0 : i32, i32
  }
  func.func @transform_4(%arg0: i32) -> (i32, i32) {
    %c0_i32 = arith.constant 0 : i32
    %c0_i32_0 = arith.constant 0 : i32
    %c0_i32_1 = arith.constant 0 : i32
    return %c0_i32, %c0_i32_0 : i32, i32
  }
  func.func @transform_5(%arg0: i32) -> (i32, i32) {
    %c0_i32 = arith.constant 0 : i32
    %c0_i32_0 = arith.constant 0 : i32
    %c0_i32_1 = arith.constant 0 : i32
    return %c0_i32, %c0_i32_0 : i32, i32
  }
  func.func @transform_6(%arg0: i32) -> (i32, i32) {
    %c0_i32 = arith.constant 0 : i32
    %c0_i32_0 = arith.constant 0 : i32
    %c0_i32_1 = arith.constant 0 : i32
    return %c0_i32, %c0_i32_0 : i32, i32
  }
  func.func @transform_7(%arg0: i32) -> (i32, i32) {
    %c0_i32 = arith.constant 0 : i32
    %c0_i32_0 = arith.constant 0 : i32
    %c0_i32_1 = arith.constant 0 : i32
    return %c0_i32, %c0_i32_0 : i32, i32
  }
  func.func @transform_8(%arg0: i32) -> (i32, i32) {
    %c0_i32 = arith.constant 0 : i32
    %c0_i32_0 = arith.constant 0 : i32
    %c0_i32_1 = arith.constant 0 : i32
    return %c0_i32, %c0_i32_0 : i32, i32
  }
  func.func @transform_9(%arg0: i32) -> (i32, i32) {
    %c0_i32 = arith.constant 0 : i32
    %c0_i32_0 = arith.constant 0 : i32
    %c0_i32_1 = arith.constant 0 : i32
    return %c0_i32, %c0_i32_0 : i32, i32
  }
  func.func @transform_10(%arg0: i32) -> (i32, i32) {
    %c0_i32 = arith.constant 0 : i32
    %c0_i32_0 = arith.constant 0 : i32
    return %arg0, %c0_i32 : i32, i32
  }
}

</mosaic_0001>

<bundles_post_ra>
// kernel: tpu_custom_call.1
= control target key start
LH: loop header
LB: loop body
LE: loop exit
PB: predicated region body
PF: predicated region fallthrough
CT: control target
= control target key end

     0   :  { %s742_s0 = inlined_call_operand.hbm [shape: f32[8,16], index: 0, kind: input, shape index: {}]   ;;  %s743_s1 = inlined_call_operand.vmem [shape: f32[8,4], index: 1, kind: input, shape index: {}]   ;;  %s744_s2 = inlined_call_operand.vmem [shape: f32[16,64], index: 2, kind: input, shape index: {}]   ;;  %s745_s3 = inlined_call_operand.vmem [shape: f32[1,64], index: 3, kind: input, shape index: {}]   ;;  %s746_s4 = inlined_call_operand.hbm [shape: f32[64,64], index: 4, kind: input, shape index: {}]   ;;  %s747_s5 = inlined_call_operand.vmem [shape: f32[1,64], index: 5, kind: input, shape index: {}]   ;;  %s748_s6 = inlined_call_operand.hbm [shape: f32[64,128], index: 6, kind: input, shape index: {}]   ;;  %s749_s7 = inlined_call_operand.vmem [shape: f32[1,128], index: 7, kind: input, shape index: {}]   ;;  %s750_s8 = inlined_call_operand.vmem [shape: f32[1,4], index: 8, kind: input, shape index: {}]   ;;  %s751_s9 = inlined_call_operand.<no memory space> [shape: f32[1,1], index: 9, kind: input, shape index: {}]   ;;  %s752_s10 = inlined_call_operand.hbm [shape: f32[8,128], index: 10, kind: output, shape index: {}]  }
   0x1   :  { %v15_v0 = vstv %s751_s9 }
   0x2   :  { %16 = vst [vmem:[#allocation2] sm:$0x1] %v15_v0 }
   0x3   :  { %17 = vsyncpa [#allocation4], 0 }
   0x4   :  { %18 = vsyncpa [#allocation7], 0 }
   0x5   :  { %19 = vsyncpa [#allocation5], 0  ;;  %s595_s15 = smov [#allocation6]   ;;  %s501_s19 = scalar_lea.hbm %s746_s4, 1024 }
   0x6   :  { %s41_s16 = sshll.u32 %s595_s15, 4  ;;  %p502_p0 = scmp.ne.s32.totalorder %s746_s4, %s501_s19  ;;  %s42_s16 = int_to_ptr.vmem [resolvable:$true] %s41_s16 }
   0x7   :  { %p505_p1 = scmp.lt.u32.totalorder %s501_s19, %s746_s4 }
   0x9   :  { %p507_p2 = pnand %p505_p1, %p502_p0 }
   0xb   :  { %510 = shalt.err (!%p507_p2)
}
   0xc   :  { %s511_s9 = scalar_lea.vmem %s42_s16, 1024  ;;  %p516_p4 = scmp.lt.s32.totalorder %s42_s16, %s42_s16 }
   0xd   :  { %p512_p3 = scmp.ne.s32.totalorder %s42_s16, %s511_s9  ;;  %p517_p5 = scmp.lt.s32.totalorder %s511_s9, %s511_s9 }
   0xf   :  { %p518_p6 = por %p517_p5, %p516_p4 }
  0x11   :  { %p519_p7 = pnand %p518_p6, %p512_p3 }
  0x13   :  { %522 = shalt.err (!%p519_p7)
}
  0x14   :  { %s596_s24 = smov 128   ;;  %s597_s25 = smov 8  }
  0x15   :  { %47 = dma.hbm_to_vmem [thread:$0]  %s746_s4, 1024, %s42_s16, [#allocation7], %s596_s24, %s596_s24, %s597_s25  }
  0x16   :  { %s598_s28 = smov [#allocation3]   ;;  %s599_s30 = smov [#allocation8]  }
  0x17   :  { %s26_s29 = sshll.u32 %s598_s28, 4  ;;  %s55_s11 = sshll.u32 %s599_s30, 4  ;;  %s27_s29 = int_to_ptr.vmem [resolvable:$true] %s26_s29  ;;  %s56_s11 = int_to_ptr.vmem [resolvable:$true] %s55_s11 }
  0x18   :  { %s523_s14 = scalar_lea.hbm %s742_s0, 128 }
  0x19   :  { %p524_p8 = scmp.ne.s32.totalorder %s742_s0, %s523_s14  ;;  %p527_p9 = scmp.lt.u32.totalorder %s523_s14, %s742_s0 }
  0x1b   :  { %p529_p10 = pnand %p527_p9, %p524_p8 }
  0x1d   :  { %532 = shalt.err (!%p529_p10)
}
  0x1e   :  { %s533_s4 = scalar_lea.vmem %s27_s29, 128  ;;  %p538_p12 = scmp.lt.s32.totalorder %s27_s29, %s27_s29 }
  0x1f   :  { %p534_p11 = scmp.ne.s32.totalorder %s27_s29, %s533_s4  ;;  %p539_p13 = scmp.lt.s32.totalorder %s533_s4, %s533_s4 }
  0x21   :  { %p540_p0 = por %p539_p13, %p538_p12 }
  0x23   :  { %p541_p1 = pnand %p540_p0, %p534_p11 }
  0x25   :  { %544 = shalt.err (!%p541_p1)
}
  0x26   :  { %29 = dma.hbm_to_vmem [thread:$0]  %s742_s0, 128, %s27_s29, [#allocation4]  }
  0x27   :  { %s545_s23 = scalar_lea.hbm %s748_s6, 1024 }
  0x28   :  { %p546_p2 = scmp.ne.s32.totalorder %s748_s6, %s545_s23  ;;  %p549_p3 = scmp.lt.u32.totalorder %s545_s23, %s748_s6 }
  0x2a   :  { %p551_p4 = pnand %p549_p3, %p546_p2 }
  0x2c   :  { %554 = shalt.err (!%p551_p4)
}
  0x2d   :  { %s555_s30 = scalar_lea.vmem %s56_s11, 1024  ;;  %p560_p6 = scmp.lt.s32.totalorder %s56_s11, %s56_s11 }
  0x2e   :  { %p556_p5 = scmp.ne.s32.totalorder %s56_s11, %s555_s30  ;;  %p561_p7 = scmp.lt.s32.totalorder %s555_s30, %s555_s30 }
  0x30   :  { %p562_p8 = por %p561_p7, %p560_p6 }
  0x32   :  { %p563_p9 = pnand %p562_p8, %p556_p5 }
  0x34   :  { %566 = shalt.err (!%p563_p9)
}
  0x35   :  { %61 = dma.hbm_to_vmem [thread:$0]  %s748_s6, 1024, %s56_s11, [#allocation7], %s596_s24, %s596_s24, %s597_s25  }
  0x36   :  { %589 = dma.done.wait [#allocation4], 128  }
  0x37   :  { %590 = vsyncadd [#allocation4], 4294967168 }
  0x38   :  { %591 = dma.done.wait [#allocation7], 2048  }
  0x39   :  { %592 = vsyncadd [#allocation7], 4294965248  ;;  %v600_v1 = vmov 0.0|0.0   ;;  %vm601_vm0 = vmmov 0   ;;  %v602_v2 = vmov 0.0   ;;  %v78_v3 = vld [vmem:[%s744_s2] sm:$0xff]  ;;  %v341_v46 = vlaneseq }
  0x3a   :  { %457 = vmatprep.subr.bf16.mxu0 %v600_v1  ;;  %416 = vmatprep.mubr.msk.f32.mxu0 %vm601_vm0, %v602_v2  ;;  %v79_v4 = vld [vmem:[%s744_s2 + $0x8] sm:$0xff]  ;;  %v163_v7 = vld [vmem:[#allocation6 + $0x8] sm:$0xff]  ;;  %vm87_vm1 = vcmask 130048   ;;  %v164_v10 = vld [vmem:[#allocation6 + $0x10] sm:$0xff]  ;;  %vm177_vm2 = vcmask 523264   ;;  %vm356_vm4 = vcmask 31744  }
  0x3b   :  { %460 = vmatprep.subr.bf16.mxu1 %v600_v1  ;;  %435 = vmatprep.mubr.msk.f32.mxu1 %vm601_vm0, %v602_v2  ;;  %v458_v5 = vpack.c.bf16 %v79_v4, %v78_v3  ;;  %v162_v6 = vld [vmem:[#allocation6] sm:$0xff]  ;;  %v77_v9 = vld [vmem:[#allocation3] sm:$0xff]  ;;  %v167_v14 = vld [vmem:[#allocation6 + $0x28] sm:$0xff]  ;;  %v342_v47 = vand.u32 127, %v341_v46  ;;  %s603_s4 = smov [#allocation9]  }
  0x3c   :  { %v461_v8 = vpack.c.bf16 %v163_v7, %v162_v6  ;;  %v165_v11 = vld [vmem:[#allocation6 + $0x18] sm:$0xff]  ;;  %v166_v13 = vld [vmem:[#allocation6 + $0x20] sm:$0xff]  ;;  %v168_v16 = vld [vmem:[#allocation6 + $0x30] sm:$0xff]  ;;  %s374_s16 = sshll.u32 %s603_s4, 4  ;;  %s375_s16 = int_to_ptr.vmem [resolvable:$true] %s374_s16 }
  0x3d   :  { %459 = vmatpush3.bf16.msra.mxu0 %v458_v5  ;;  %v464_v12 = vpack.c.bf16 %v165_v11, %v164_v10  ;;  %v467_v15 = vpack.c.bf16 %v167_v14, %v166_v13  ;;  %v169_v17 = vld [vmem:[#allocation6 + $0x38] sm:$0xff]  ;;  %v252_v19 = vld [vmem:[#allocation8] sm:$0xff]  ;;  %v253_v20 = vld [vmem:[#allocation8 + $0x8] sm:$0xff]  ;;  %vm343_vm3 = vcmp.lt.s32.totalorder %v342_v47, 4  ;;  %vm365_vm5 = vcmp.eq.s32.totalorder %v342_v47, 5  ;;  %p572_p11 = scmp.lt.s32.totalorder %s375_s16, %s375_s16 }
  0x3e   :  { %462 = vmatpush3.bf16.msra.mxu1 %v461_v8  ;;  %472 = vmatprep.subr.bf16.mxu0 %v600_v1  ;;  %v470_v18 = vpack.c.bf16 %v169_v17, %v168_v16  ;;  %v473_v21 = vpack.c.bf16 %v253_v20, %v252_v19  ;;  %v384_v22 = vld [vmem:[%s745_s3] ss:$0 sm:$0xff]  ;;  %v255_v28 = vld [vmem:[#allocation8 + $0x18] sm:$0xff]  ;;  %v256_v30 = vld [vmem:[#allocation8 + $0x20] sm:$0xff] }
  0x3f   :  { %463 = vmatprep.subr.bf16.mxu1 %v600_v1  ;;  %v254_v27 = vld [vmem:[#allocation8 + $0x10] sm:$0xff]  ;;  %v257_v31 = vld [vmem:[#allocation8 + $0x28] sm:$0xff]  ;;  %v259_v34 = vld [vmem:[#allocation8 + $0x38] sm:$0xff] }
  0x40   :  { %417 = vmatmul.mubr.msk.f32.vlgmr.msra.gmra.mrb[0].mxu0 %vm87_vm1, %v77_v9  ;;  %v476_v29 = vpack.c.bf16 %v255_v28, %v254_v27  ;;  %v479_v32 = vpack.c.bf16 %v257_v31, %v256_v30  ;;  %v258_v33 = vld [vmem:[#allocation8 + $0x30] sm:$0xff] }
  0x41   :  { %454 = vmatprep.mubr.msk.f32.mxu0 %vm601_vm0, %v602_v2  ;;  %474 = vmatpush3.bf16.msra.mxu0 %v473_v21  ;;  %v482_v35 = vpack.c.bf16 %v259_v34, %v258_v33  ;;  %v386_v36 = vld [vmem:[%s747_s5] ss:$0 sm:$0xff] }
  0x42   :  { %465 = vmatpush3.bf16.msra.mxu1 %v464_v12  ;;  %475 = vmatprep.subr.bf16.mxu0 %v600_v1  ;;  %v361_v41 = vld [vmem:[#allocation2] sm:$0x1] }
  0x43   :  { %466 = vmatprep.subr.bf16.mxu1 %v600_v1  ;;  %484 = vpush %v361_v41  ;;  %v388_v42 = vld [vmem:[%s749_s7] ss:$0 sm:$0xff] }
  0x44   :  { %v345_v48 = vld [vmem:[%s743_s1] sm:$0xff]  ;;  %s567_s1 = scalar_lea.vmem %s375_s16, 128 }
  0x45   :  { %477 = vmatpush3.bf16.msra.mxu0 %v476_v29  ;;  %v390_v52 = vld [vmem:[%s750_s8] ss:$0 sm:$0xff]  ;;  %p568_p10 = scmp.ne.s32.totalorder %s375_s16, %s567_s1  ;;  %p573_p12 = scmp.lt.s32.totalorder %s567_s1, %s567_s1 }
  0x46   :  { %468 = vmatpush3.bf16.msra.mxu1 %v467_v15  ;;  %478 = vmatprep.subr.bf16.mxu0 %v600_v1 }
  0x47   :  { %469 = vmatprep.subr.bf16.mxu1 %v600_v1  ;;  %p574_p13 = por %p573_p12, %p572_p11 }
  0x49   :  { %480 = vmatpush3.bf16.msra.mxu0 %v479_v32  ;;  %p575_p0 = pnand %p574_p13, %p568_p10 }
  0x4a   :  { %471 = vmatpush3.bf16.msra.mxu1 %v470_v18  ;;  %481 = vmatprep.subr.bf16.mxu0 %v600_v1 }
  0x4d   :  { %483 = vmatpush3.bf16.msra.mxu0 %v482_v35 }
  0x74   :  { %s485_s7 = spop %484 }
  0x75   :  { %v363_v57 = vstv %s485_s7 }
 0x113   :  { %v157_v23 = vpop.f32.mrb[0].mxu0 }
 0x114   :  { %v158_v24 = vadd.f32 %v384_v22, %v157_v23  ;;  %v418_v25 = vpop.f32.mrb[1].mxu0 }
 0x116   :  { %495 = vtanh.f32 %v158_v24 }
 0x120   :  { %v496_v26 = vpop.eup %495 }
 0x121   :  { %436 = vmatmul.mubr.msk.f32.vlgmr.msra.gmra.mrb[0].mxu1 %vm177_vm2, %v496_v26 }
 0x1f4   :  { %v247_v37 = vpop.f32.mrb[0].mxu1 }
 0x1f5   :  { %v248_v38 = vadd.f32 %v386_v36, %v247_v37  ;;  %v437_v39 = vpop.f32.mrb[1].mxu1 }
 0x1f7   :  { %497 = vtanh.f32 %v248_v38 }
 0x201   :  { %v498_v40 = vpop.eup %497 }
 0x202   :  { %455 = vmatmul.mubr.msk.f32.vlgmr.msra.gmra.mrb[2].mxu0 %vm177_vm2, %v498_v40 }
 0x2d5   :  { %v336_v43 = vpop.f32.mrb[2].mxu0 }
 0x2d6   :  { %v337_v44 = vadd.f32 %v388_v42, %v336_v43  ;;  %v456_v45 = vpop.f32.mrb[3].mxu0 }
 0x2d8   :  { %499 = vtanh.f32 %v337_v44 }
 0x2e2   :  { %v500_v49 = vpop.eup %499 }
 0x2e3   :  { %v346_v50 = vsub.f32 %v345_v48, %v500_v49  ;;  %v344_v51 = vsel %vm343_vm3, %v500_v49, %v337_v44 }
 0x2e5   :  { %v347_v53 = vmul.f32 %v346_v50, %v346_v50 }
 0x2e7   :  { %v355_v54 = vmul.f32 %v390_v52, %v347_v53 }
 0x2e9   :  { %v357_v55 = vsel %vm356_vm4, %v355_v54, 0.0 }
 0x2ea   :  { %358 = vadd.xlane.f32.xlu0 %v357_v55 }
 0x377   :  { %v359_v56 = vpop.xlane.xlu0 %358 }
 0x378   :  { %v360_v58 = vmul.f32 -0.5, %v359_v56 }
 0x37a   :  { %v364_v59 = vadd.f32 %v363_v57, %v360_v58 }
 0x37c   :  { %v366_v60 = vsel %vm365_vm5, %v364_v59, %v344_v51 }
 0x37d   :  { %367 = vst [vmem:[#allocation9] sm:$0xff] %v366_v60 }
 0x37e   :  { %578 = shalt.err (!%p575_p0)
}
 0x37f   :  { %s579_s21 = scalar_lea.hbm %s752_s10, 128 }
 0x380   :  { %p580_p1 = scmp.ne.s32.totalorder %s752_s10, %s579_s21  ;;  %p583_p2 = scmp.lt.u32.totalorder %s579_s21, %s752_s10 }
 0x382   :  { %p585_p3 = pnand %p583_p2, %p580_p1 }
 0x384   :  { %588 = shalt.err (!%p585_p3)
}
 0x385   :  { %377 = dma.vmem_to_hbm [thread:$0]  %s375_s16, 128, %s752_s10, [#allocation5]  }
 0x386   :  { %593 = dma.done.wait [#allocation5], 128  }
 0x387   :  { %594 = vsyncadd [#allocation5], 4294967168 }
 0x388   :  { %381 = vsyncpa [#allocation4], 1 }
 0x389   :  { %382 = vsyncpa [#allocation7], 1 }
 0x38a   :  { %383 = vsyncpa [#allocation5], 1 }

</bundles_post_ra>
